<compile_context>
chip_gen: v5e
topology: v5e:2x2
jax: 0.10.0
libtpu: 0.0.40
codegen_flags: <defaults>
</compile_context>

<pallas_src>
import jax
import jax.numpy as jnp
from jax.experimental import pallas as pl
from jax.experimental.pallas import tpu as pltpu


def _round_up(x, m):
    return ((x + m - 1) // m) * m


def _skipgram_loss_kernel(n_valid_ref, center_ref, target_ref, neg_ref, out_ref):
    tb = center_ref.shape[0]
    i = pl.program_id(0)

    # Upcast bf16-stored tiles to f32 for all accumulation.
    c = center_ref[...].astype(jnp.float32)          # (TB, Dp)
    t = target_ref[...].astype(jnp.float32)          # (TB, Dp)
    n = neg_ref[...].astype(jnp.float32)             # (TB, K, Dp)

    # positive_score[b] = <target[b], center[b]>
    pos_score = jnp.sum(t * c, axis=-1, keepdims=True)            # (TB, 1)

    # negative_score[b] = sum_k <-U[neg[b,k]], center[b]> = -<sum_k U[...], center[b]>
    neg_sum = jnp.sum(n, axis=1)                                   # (TB, Dp), f32 accumulation
    neg_score = -jnp.sum(neg_sum * c, axis=-1, keepdims=True)      # (TB, 1)

    # Numerically-stable logsigmoid(x) = min(x, 0) - log1p(exp(-|x|))
    def logsigmoid(x):
        return jnp.minimum(x, 0.0) - jnp.log1p(jnp.exp(-jnp.abs(x)))

    loss = logsigmoid(pos_score) + logsigmoid(neg_score)           # (TB, 1)

    # Mask out padded batch rows (true batch size arrives via scalar prefetch).
    row_ids = i * tb + jax.lax.broadcasted_iota(jnp.int32, (tb, 128), 0)
    valid = (row_ids < n_valid_ref[0])[:, :1]                      # (TB, 1) bool
    partial = jnp.sum(jnp.where(valid, loss, 0.0))

    # Lane-dense partial-sum output: one full (8, 128) tile per grid step.
    out_ref[...] = jnp.full(out_ref.shape, partial, dtype=out_ref.dtype)


def skipgram_neg_sampling_loss(emb_v, emb_u, center_words, target_words, negative_words,
                               store_dtype=jnp.bfloat16,
                               vmem_buffer_budget_bytes=40 << 20):
    """center_words/target_words: (B,1) or (B,) int32; negative_words: (B, K) int32."""
    center_idx = center_words.reshape(-1)
    target_idx = target_words.reshape(-1)
    B = int(center_idx.shape[0])
    K = int(negative_words.shape[1])
    D = int(emb_v.shape[1])

    LANE = 128
    d_pad = _round_up(D, LANE)

    # Cast the (small) tables to the storage dtype and pad D so gathered rows are
    # lane-dense; zero padding does not change the dot products.
    v_tab = emb_v.astype(store_dtype)
    u_tab = emb_u.astype(store_dtype)
    if d_pad != D:
        v_tab = jnp.pad(v_tab, ((0, 0), (0, d_pad - D)))
        u_tab = jnp.pad(u_tab, ((0, 0), (0, d_pad - D)))

    # Embedding gathers stay in XLA (indexing glue). For large D (row >= ~1 KB) an
    # in-kernel DMA row gather from emb_u kept in pl.ANY would remove one HBM
    # round trip on the dominant negs array.
    # TODO(synk): in-kernel make_async_copy gather of negative rows for large D.
    center = jnp.take(v_tab, center_idx, axis=0)          # (B, Dp)
    target = jnp.take(u_tab, target_idx, axis=0)          # (B, Dp)
    negs = jnp.take(u_tab, negative_words, axis=0)        # (B, K, Dp)

    # Batch tile: biggest tile whose double-buffered inputs fit the VMEM budget.
    itemsize = jnp.dtype(store_dtype).itemsize
    bytes_per_row = (K + 2) * d_pad * itemsize
    tb = vmem_buffer_budget_bytes // (2 * bytes_per_row)
    tb = (tb // 8) * 8
    tb = max(8, min(tb, 1024, _round_up(B, 8)))

    b_pad = _round_up(B, tb)
    if b_pad != B:
        center = jnp.pad(center, ((0, b_pad - B), (0, 0)))
        target = jnp.pad(target, ((0, b_pad - B), (0, 0)))
        negs = jnp.pad(negs, ((0, b_pad - B), (0, 0), (0, 0)))
    num_tiles = b_pad // tb

    n_valid = jnp.array([B], dtype=jnp.int32)

    partials = pl.pallas_call(
        _skipgram_loss_kernel,
        out_shape=jax.ShapeDtypeStruct((num_tiles, 8, 128), jnp.float32),
        grid_spec=pltpu.PrefetchScalarGridSpec(
            num_scalar_prefetch=1,
            grid=(num_tiles,),
            in_specs=[
                pl.BlockSpec((tb, d_pad), lambda i, n: (i, 0)),
                pl.BlockSpec((tb, d_pad), lambda i, n: (i, 0)),
                pl.BlockSpec((tb, K, d_pad), lambda i, n: (i, 0, 0)),
            ],
            out_specs=pl.BlockSpec((1, 8, 128), lambda i, n: (i, 0, 0)),
        ),
        compiler_params=pltpu.CompilerParams(
            dimension_semantics=("parallel",),
            vmem_limit_bytes=48 << 20,
        ),
    )(n_valid, center, target, negs)

    # Per-tile partial sums -> final loss = -sum / B.
    return -(jnp.sum(partials[:, 0, 0]) / B)


def _reference_loss(emb_v, emb_u, center_words, target_words, negative_words,
                    store_dtype=jnp.float32):
    v = emb_v.astype(store_dtype).astype(jnp.float32)
    u = emb_u.astype(store_dtype).astype(jnp.float32)
    center = jnp.take(v, center_words.reshape(-1), axis=0)
    target = jnp.take(u, target_words.reshape(-1), axis=0)
    negs = jnp.take(u, negative_words, axis=0)
    pos = jnp.sum(target * center, axis=-1, keepdims=True)
    neg = -jnp.sum(jnp.sum(negs, axis=1) * center, axis=-1, keepdims=True)
    logsig = lambda x: jnp.minimum(x, 0.0) - jnp.log1p(jnp.exp(-jnp.abs(x)))
    return -jnp.mean(logsig(pos) + logsig(neg))


if __name__ == "__main__":
    vocab_size, emb_dim = 50, 32
    B, K = 8, 5

    key = jax.random.PRNGKey(0)
    k_v, k_u, k_c, k_t, k_n = jax.random.split(key, 5)

    initrange = (2.0 / (vocab_size + emb_dim)) ** 0.5
    # The module zeroes embedding_u (uniform_(-0.0, 0.0)); use small non-zero
    # deterministic values for both tables so the kernel path is exercised.
    emb_v = jax.random.uniform(k_v, (vocab_size, emb_dim), jnp.float32,
                               minval=-initrange, maxval=initrange)
    emb_u = jax.random.uniform(k_u, (vocab_size, emb_dim), jnp.float32,
                               minval=-initrange, maxval=initrange)

    center_words = jax.random.randint(k_c, (B, 1), 0, vocab_size, dtype=jnp.int32)
    target_words = jax.random.randint(k_t, (B, 1), 0, vocab_size, dtype=jnp.int32)
    negative_words = jax.random.randint(k_n, (B, K), 0, vocab_size, dtype=jnp.int32)

    loss = skipgram_neg_sampling_loss(emb_v, emb_u, center_words, target_words,
                                      negative_words)
    loss = jax.block_until_ready(loss)

    # Tight check vs. a reference with identical bf16-storage / f32-accumulation
    # semantics, and a loose check vs. the pure-f32 PyTorch-equivalent math.
    ref_bf16 = _reference_loss(emb_v, emb_u, center_words, target_words,
                               negative_words, store_dtype=jnp.bfloat16)
    ref_f32 = _reference_loss(emb_v, emb_u, center_words, target_words,
                              negative_words, store_dtype=jnp.float32)
    assert jnp.allclose(loss, ref_bf16, atol=1e-5, rtol=1e-5), (loss, ref_bf16)
    assert jnp.allclose(loss, ref_f32, atol=1e-2, rtol=1e-2), (loss, ref_f32)
    print("KERNEL_OK")
</pallas_src>

<mosaic_0001>
module attributes {stable_mosaic.version = 11 : i64} {
  func.func @_skipgram_loss_kernel(%arg0: i32, %arg1: memref<1xi32, #tpu.memory_space<smem>>, %arg2: memref<8x128xbf16, #tpu.memory_space<vmem>>, %arg3: memref<8x128xbf16, #tpu.memory_space<vmem>>, %arg4: memref<8x5x128xbf16, #tpu.memory_space<vmem>>, %arg5: memref<1x8x128xf32, #tpu.memory_space<vmem>>) attributes {dimension_semantics = [#tpu.dimension_semantics<parallel>], iteration_bounds = array<i64: 1>, scalar_prefetch = 1 : i64, scratch_operands = 0 : i64, tpu.core_type = #tpu.core_type<tc>, window_params = [{transform_indices = @transform_0, window_bounds = array<i64: 8, 128>}, {transform_indices = @transform_1, window_bounds = array<i64: 8, 128>}, {transform_indices = @transform_2, window_bounds = array<i64: 8, 5, 128>}, {transform_indices = @transform_3, window_bounds = array<i64: 1, 8, 128>}]} {
    %c0 = arith.constant 0 : index
    %c0_0 = arith.constant 0 : index
    %0 = vector.load %arg2[%c0, %c0_0] : memref<8x128xbf16, #tpu.memory_space<vmem>>, vector<8x128xbf16>
    %1 = arith.extf %0 : vector<8x128xbf16> to vector<8x128xf32>
    %c0_1 = arith.constant 0 : index
    %c0_2 = arith.constant 0 : index
    %2 = vector.load %arg3[%c0_1, %c0_2] : memref<8x128xbf16, #tpu.memory_space<vmem>>, vector<8x128xbf16>
    %3 = arith.extf %2 : vector<8x128xbf16> to vector<8x128xf32>
    %c0_3 = arith.constant 0 : index
    %c0_4 = arith.constant 0 : index
    %c0_5 = arith.constant 0 : index
    %4 = vector.load %arg4[%c0_3, %c0_4, %c0_5] : memref<8x5x128xbf16, #tpu.memory_space<vmem>>, vector<8x5x128xbf16>
    %5 = arith.extf %4 : vector<8x5x128xbf16> to vector<8x5x128xf32>
    %6 = arith.mulf %3, %1 : vector<8x128xf32>
    %cst = arith.constant dense<0.000000e+00> : vector<8xf32>
    %7 = vector.multi_reduction <add>, %6, %cst [1] : vector<8x128xf32> to vector<8xf32>
    %8 = vector.shape_cast %7 : vector<8xf32> to vector<8x1xf32>
    %cst_6 = arith.constant dense<0.000000e+00> : vector<8x128xf32>
    %9 = vector.multi_reduction <add>, %5, %cst_6 [1] : vector<8x5x128xf32> to vector<8x128xf32>
    %10 = arith.mulf %9, %1 : vector<8x128xf32>
    %cst_7 = arith.constant dense<0.000000e+00> : vector<8xf32>
    %11 = vector.multi_reduction <add>, %10, %cst_7 [1] : vector<8x128xf32> to vector<8xf32>
    %12 = vector.shape_cast %11 : vector<8xf32> to vector<8x1xf32>
    %cst_8 = arith.constant 0.000000e+00 : f32
    %13 = vector.broadcast %cst_8 : f32 to vector<8x1xf32>
    %14 = arith.subf %13, %12 : vector<8x1xf32>
    %cst_9 = arith.constant 0.000000e+00 : f32
    %15 = vector.broadcast %cst_9 : f32 to vector<8x1xf32>
    %16 = arith.minimumf %8, %15 : vector<8x1xf32>
    %17 = math.absf %8 : vector<8x1xf32>
    %cst_10 = arith.constant 0.000000e+00 : f32
    %18 = vector.broadcast %cst_10 : f32 to vector<8x1xf32>
    %19 = arith.subf %18, %17 : vector<8x1xf32>
    %20 = math.exp %19 : vector<8x1xf32>
    %21 = math.log1p %20 : vector<8x1xf32>
    %22 = arith.subf %16, %21 : vector<8x1xf32>
    %cst_11 = arith.constant 0.000000e+00 : f32
    %23 = vector.broadcast %cst_11 : f32 to vector<8x1xf32>
    %24 = arith.minimumf %14, %23 : vector<8x1xf32>
    %25 = math.absf %14 : vector<8x1xf32>
    %cst_12 = arith.constant 0.000000e+00 : f32
    %26 = vector.broadcast %cst_12 : f32 to vector<8x1xf32>
    %27 = arith.subf %26, %25 : vector<8x1xf32>
    %28 = math.exp %27 : vector<8x1xf32>
    %29 = math.log1p %28 : vector<8x1xf32>
    %30 = arith.subf %24, %29 : vector<8x1xf32>
    %31 = arith.addf %22, %30 : vector<8x1xf32>
    %c8_i32 = arith.constant 8 : i32
    %32 = arith.muli %arg0, %c8_i32 : i32
    %33 = tpu.iota {dimensions = array<i32: 0>} : vector<8x128xi32>
    %34 = vector.broadcast %32 : i32 to vector<8x128xi32>
    %35 = arith.addi %34, %33 : vector<8x128xi32>
    %c0_13 = arith.constant 0 : index
    %36 = memref.load %arg1[%c0_13] : memref<1xi32, #tpu.memory_space<smem>>
    %37 = vector.broadcast %36 : i32 to vector<8x128xi32>
    %38 = arith.cmpi slt, %35, %37 : vector<8x128xi32>
    %39 = vector.extract_strided_slice %38 {offsets = [0, 0], sizes = [8, 1], strides = [1, 1]} : vector<8x128xi1> to vector<8x1xi1>
    %cst_14 = arith.constant 0.000000e+00 : f32
    %40 = vector.broadcast %cst_14 : f32 to vector<8x1xf32>
    %41 = arith.select %39, %31, %40 : vector<8x1xi1>, vector<8x1xf32>
    %42 = vector.shape_cast %41 : vector<8x1xf32> to vector<1x8x1xf32>
    %cst_15 = arith.constant dense<0.000000e+00> : vector<1xf32>
    %43 = vector.multi_reduction <add>, %42, %cst_15 [1, 2] : vector<1x8x1xf32> to vector<1xf32>
    %44 = vector.shape_cast %43 : vector<1xf32> to vector<1x1x1xf32>
    %45 = vector.extract %44[0, 0, 0] : f32 from vector<1x1x1xf32>
    %46 = vector.broadcast %45 : f32 to vector<1x8x128xf32>
    %c0_16 = arith.constant 0 : index
    %c0_17 = arith.constant 0 : index
    %c0_18 = arith.constant 0 : index
    %47 = vector.load %arg5[%c0_16, %c0_17, %c0_18] : memref<1x8x128xf32, #tpu.memory_space<vmem>>, vector<1x8x128xf32>
    tpu.vector_store %arg5[%c0_16, %c0_17, %c0_18], %46 {strides = array<i32>} : memref<1x8x128xf32, #tpu.memory_space<vmem>>, vector<1x8x128xf32>,
    return
  }
  func.func @transform_0(%arg0: i32, %arg1: memref<1xi32, #tpu.memory_space<smem>>) -> (i32, i32) {
    %c0_i32 = arith.constant 0 : i32
    %c0_i32_0 = arith.constant 0 : i32
    return %arg0, %c0_i32 : i32, i32
  }
  func.func @transform_1(%arg0: i32, %arg1: memref<1xi32, #tpu.memory_space<smem>>) -> (i32, i32) {
    %c0_i32 = arith.constant 0 : i32
    %c0_i32_0 = arith.constant 0 : i32
    return %arg0, %c0_i32 : i32, i32
  }
  func.func @transform_2(%arg0: i32, %arg1: memref<1xi32, #tpu.memory_space<smem>>) -> (i32, i32, i32) {
    %c0_i32 = arith.constant 0 : i32
    %c0_i32_0 = arith.constant 0 : i32
    %c0_i32_1 = arith.constant 0 : i32
    return %arg0, %c0_i32, %c0_i32_0 : i32, i32, i32
  }
  func.func @transform_3(%arg0: i32, %arg1: memref<1xi32, #tpu.memory_space<smem>>) -> (i32, i32, i32) {
    %c0_i32 = arith.constant 0 : i32
    %c0_i32_0 = arith.constant 0 : i32
    %c0_i32_1 = arith.constant 0 : i32
    return %arg0, %c0_i32, %c0_i32_0 : i32, i32, i32
  }
}

</mosaic_0001>

<bundles_post_ra>
// kernel: tpu_custom_call.1
= control target key start
LH: loop header
LB: loop body
LE: loop exit
PB: predicated region body
PF: predicated region fallthrough
CT: control target
= control target key end

     0   :  { %vm40_vm0 = vcmask 1044480   ;;  %s333_s0 = inlined_call_operand.<no memory space> [shape: s32[1], index: 0, kind: input, shape index: {}]   ;;  %s334_s1 = inlined_call_operand.vmem [shape: bf16[8,128], index: 1, kind: input, shape index: {}]   ;;  %s335_s2 = inlined_call_operand.vmem [shape: bf16[8,128], index: 2, kind: input, shape index: {}]   ;;  %s336_s3 = inlined_call_operand.vmem [shape: bf16[8,5,128], index: 3, kind: input, shape index: {}]   ;;  %s337_s4 = inlined_call_operand.hbm [shape: f32[1,8,128], index: 4, kind: output, shape index: {}]  }
   0x1   :  { %v17_v0 = vld [vmem:[%s334_s1] sm:$0xf]  ;;  %v22_v2 = vld [vmem:[%s336_s3 + $0x4] sm:$0x7]  ;;  %v23_v3 = vld [vmem:[%s336_s3 + $0x8] sm:$0x7] }
   0x2   :  { %v21_v1 = vld [vmem:[%s336_s3] sm:$0x7]  ;;  %v24_v4 = vld [vmem:[%s336_s3 + $0xc] sm:$0x7]  ;;  %v25_v5 = vld [vmem:[%s336_s3 + $0x10] sm:$0x7]  ;;  %v30_v7 = vunpack.c.l.bf16 %v22_v2  ;;  %v304_v8 = vunpack.c.l.bf16 %v17_v0  ;;  %v31_v12 = vunpack.c.l.bf16 %v23_v3 }
   0x3   :  { %v29_v6 = vunpack.c.l.bf16 %v21_v1  ;;  %v26_v9 = vld [vmem:[%s336_s3 + $0x14] sm:$0x7]  ;;  %v27_v10 = vld [vmem:[%s336_s3 + $0x18] sm:$0x7]  ;;  %v28_v11 = vld [vmem:[%s336_s3 + $0x1c] sm:$0x7]  ;;  %v32_v13 = vunpack.c.l.bf16 %v24_v4  ;;  %v33_v14 = vunpack.c.l.bf16 %v25_v5 }
   0x4   :  { %v34_v15 = vunpack.c.l.bf16 %v26_v9  ;;  %v35_v16 = vunpack.c.l.bf16 %v27_v10  ;;  %v36_v17 = vunpack.c.l.bf16 %v28_v11 }
   0x5   :  { %10 = vsyncpa [#allocation5], 0  ;;  %v41_v18 = vsel %vm40_vm0, %v29_v6, 0.0  ;;  %v48_v19 = vsel %vm40_vm0, %v30_v7, 0.0  ;;  %v55_v20 = vsel %vm40_vm0, %v31_v12, 0.0  ;;  %v62_v21 = vsel %vm40_vm0, %v32_v13, 0.0 }
   0x6   :  { %v42_v22 = vrot.slane %v41_v18, 4  ;;  %v49_v23 = vrot.slane %v48_v19, 4  ;;  %v56_v24 = vrot.slane %v55_v20, 4  ;;  %v63_v25 = vrot.slane %v62_v21, 4  ;;  %s260_s8 = smov [#allocation4]   ;;  %s214_s11 = sshll.u32 %s337_s4, 4  ;;  %s215_s11 = int_to_ptr.hbm [resolvable:$true] %s214_s11 }
   0x7   :  { %v69_v26 = vsel %vm40_vm0, %v33_v14, 0.0  ;;  %v76_v27 = vsel %vm40_vm0, %v34_v15, 0.0  ;;  %v83_v28 = vsel %vm40_vm0, %v35_v16, 0.0  ;;  %v90_v29 = vsel %vm40_vm0, %v36_v17, 0.0  ;;  %s212_s9 = sshll.u32 %s260_s8, 4  ;;  %s213_s9 = int_to_ptr.vmem [resolvable:$true] %s212_s9 }
   0x8   :  { %v43_v30 = vadd.f32 %v42_v22, %v41_v18  ;;  %v50_v31 = vadd.f32 %v49_v23, %v48_v19  ;;  %v57_v32 = vadd.f32 %v56_v24, %v55_v20  ;;  %v64_v33 = vadd.f32 %v63_v25, %v62_v21 }
   0x9   :  { %v70_v34 = vrot.slane %v69_v26, 4  ;;  %v77_v35 = vrot.slane %v76_v27, 4  ;;  %v84_v36 = vrot.slane %v83_v28, 4  ;;  %v91_v37 = vrot.slane %v90_v29, 4 }
   0xa   :  { %v44_v38 = vrot.slane %v43_v30, 2  ;;  %v51_v39 = vrot.slane %v50_v31, 2  ;;  %v58_v40 = vrot.slane %v57_v32, 2  ;;  %v65_v41 = vrot.slane %v64_v33, 2 }
   0xb   :  { %v71_v42 = vadd.f32 %v70_v34, %v69_v26  ;;  %v78_v43 = vadd.f32 %v77_v35, %v76_v27  ;;  %v85_v44 = vadd.f32 %v84_v36, %v83_v28  ;;  %v92_v45 = vadd.f32 %v91_v37, %v90_v29 }
   0xc   :  { %v45_v46 = vadd.f32 %v44_v38, %v43_v30  ;;  %v52_v47 = vadd.f32 %v51_v39, %v50_v31  ;;  %v59_v48 = vadd.f32 %v58_v40, %v57_v32  ;;  %v66_v49 = vadd.f32 %v65_v41, %v64_v33  ;;  %v19_v38 = vld [vmem:[%s335_s2] sm:$0xf] }
   0xd   :  { %v72_v50 = vrot.slane %v71_v42, 2  ;;  %v79_v51 = vrot.slane %v78_v43, 2  ;;  %v86_v52 = vrot.slane %v85_v44, 2  ;;  %v93_v53 = vrot.slane %v92_v45, 2 }
   0xe   :  { %v46_v54 = vrot.slane %v45_v46, 1  ;;  %v53_v55 = vrot.slane %v52_v47, 1  ;;  %v60_v56 = vrot.slane %v59_v48, 1  ;;  %v67_v57 = vrot.slane %v66_v49, 1 }
   0xf   :  { %v73_v58 = vadd.f32 %v72_v50, %v71_v42  ;;  %v80_v59 = vadd.f32 %v79_v51, %v78_v43  ;;  %v87_v60 = vadd.f32 %v86_v52, %v85_v44  ;;  %v94_v61 = vadd.f32 %v93_v53, %v92_v45 }
  0x10   :  { %v47_v62 = vadd.f32 %v46_v54, %v45_v46  ;;  %v54_v63 = vadd.f32 %v53_v55, %v52_v47  ;;  %v61_v0 = vadd.f32 %v60_v56, %v59_v48  ;;  %v68_v1 = vadd.f32 %v67_v57, %v66_v49 }
  0x11   :  { %v74_v2 = vrot.slane %v73_v58, 1  ;;  %v81_v3 = vrot.slane %v80_v59, 1  ;;  %v88_v4 = vrot.slane %v87_v60, 1  ;;  %v95_v5 = vrot.slane %v94_v61, 1 }
  0x12   :  { %v98_v6 = vrot.slane %v304_v8, 1  ;;  %v99_v7 = vrot.slane %v304_v8, 2  ;;  %v100_v9 = vrot.slane %v304_v8, 3  ;;  %v101_v10 = vrot.slane %v304_v8, 4 }
  0x13   :  { %v75_v11 = vadd.f32 %v74_v2, %v73_v58  ;;  %v82_v12 = vadd.f32 %v81_v3, %v80_v59  ;;  %v89_v13 = vadd.f32 %v88_v4, %v87_v60  ;;  %v96_v14 = vadd.f32 %v95_v5, %v94_v61 }
  0x14   :  { %v102_v15 = vrot.slane %v304_v8, 5  ;;  %v103_v16 = vrot.slane %v304_v8, 6  ;;  %v104_v17 = vrot.slane %v304_v8, 7  ;;  %v113_v18 = vmul.f32 %v47_v62, %v304_v8 }
  0x15   :  { %v114_v19 = vmul.f32 %v98_v6, %v54_v63  ;;  %v115_v20 = vmul.f32 %v99_v7, %v61_v0  ;;  %v116_v21 = vmul.f32 %v100_v9, %v68_v1  ;;  %v117_v22 = vmul.f32 %v101_v10, %v75_v11 }
  0x16   :  { %v118_v23 = vmul.f32 %v102_v15, %v82_v12  ;;  %v119_v24 = vmul.f32 %v103_v16, %v89_v13  ;;  %v120_v25 = vmul.f32 %v104_v17, %v96_v14  ;;  %vm130_vm1 = vcmask 1041409  }
  0x17   :  { %v129_v26 = vrot.slane %v114_v19, 7  ;;  %v132_v27 = vrot.slane %v115_v20, 6  ;;  %vm133_vm2 = vcmask 1042434   ;;  %v135_v28 = vrot.slane %v116_v21, 5 }
  0x18   :  { %vm136_vm3 = vcmask 1043459   ;;  %v138_v29 = vrot.slane %v117_v22, 4  ;;  %vm139_vm4 = vcmask 1044484   ;;  %v141_v31 = vrot.slane %v118_v23, 3 }
  0x19   :  { %v131_v30 = vsel %vm130_vm1, %v129_v26, %v113_v18  ;;  %vm142_vm5 = vcmask 1045509   ;;  %v144_v33 = vrot.slane %v119_v24, 2  ;;  %vm145_vm6 = vcmask 1046534  }
  0x1a   :  { %v134_v32 = vsel %vm133_vm2, %v132_v27, %v131_v30  ;;  %v147_v35 = vrot.slane %v120_v25, 1  ;;  %vm148_vm7 = vcmask 1047559   ;;  %v20_v41 = vunpack.c.l.bf16 %v19_v38 }
  0x1b   :  { %v137_v34 = vsel %vm136_vm3, %v135_v28, %v134_v32  ;;  %v186_v62 = vlaneseq  ;;  %v191_v9 = vstv %s333_s0  ;;  %vm194_vm11 = vcmask 7168  }
  0x1c   :  { %v140_v36 = vsel %vm139_vm4, %v138_v29, %v137_v34  ;;  %v37_v42 = vmul.f32 %v20_v41, %v304_v8 }
  0x1d   :  { %v143_v37 = vsel %vm142_vm5, %v141_v31, %v140_v36  ;;  %v187_v5 = vshrl.u32 %v186_v62, 7 }
  0x1e   :  { %v146_v39 = vsel %vm145_vm6, %v144_v33, %v143_v37 }
  0x1f   :  { %v149_v40 = vsel %vm148_vm7, %v147_v35, %v146_v39  ;;  %vm192_vm10 = vcmp.lt.s32.totalorder %v187_v5, %v191_v9 }
  0x20   :  { %151 = vadd.xlane.f32.xlu0 %v149_v40 }
  0x28   :  { %38 = vadd.xlane.f32.xlu0 %v37_v42 }
  0x93   :  { %v152_v43 = vpop.xlane.xlu0 %151 }
  0x94   :  { %v153_v44 = vsub.f32 0.0, %v152_v43 }
  0x96   :  { %v170_v45 = vand.u32 2147483647, %v153_v44  ;;  %v169_v6 = vmin.f32 %v153_v44, 0.0 }
  0x98   :  { %v171_v46 = vsub.f32 0.0, %v170_v45 }
  0x9a   :  { %v172_v47 = vmul.f32 1.442695, %v171_v46 }
  0x9b   :  { %v39_v48 = vpop.xlane.xlu0 %38 }
  0x9c   :  { %226 = vpow2.f32 %v172_v47  ;;  %v155_v49 = vand.u32 2147483647, %v39_v48  ;;  %v154_v7 = vmin.f32 %v39_v48, 0.0 }
  0x9e   :  { %v156_v50 = vsub.f32 0.0, %v155_v49 }
  0xa0   :  { %v157_v51 = vmul.f32 1.442695, %v156_v50 }
  0xa2   :  { %v227_v52 = vpop.eup %226  ;;  %228 = vpow2.f32 %v157_v51 }
  0xa3   :  { %v174_v53 = vadd.f32 1.0, %v227_v52  ;;  %v177_v55 = vmul.f32 -0.5, %v227_v52  ;;  %v180_v59 = vand.u32 2147483647, %v227_v52 }
  0xa5   :  { %230 = vlog2.f32 %v174_v53  ;;  %v178_v58 = vadd.f32 1.0, %v177_v55  ;;  %vm181_vm8 = vcmp.lt.f32.partialorder %v180_v59, 0.0004427343 }
  0xa7   :  { %v179_v0 = vmul.f32 %v227_v52, %v178_v58 }
  0xa8   :  { %v229_v54 = vpop.eup %228 }
  0xa9   :  { %v159_v56 = vadd.f32 1.0, %v229_v54  ;;  %v162_v57 = vmul.f32 -0.5, %v229_v54  ;;  %v165_v63 = vand.u32 2147483647, %v229_v54 }
  0xab   :  { %v231_v8 = vpop.eup %230  ;;  %232 = vlog2.f32 %v159_v56  ;;  %v163_v61 = vadd.f32 1.0, %v162_v57  ;;  %vm166_vm9 = vcmp.lt.f32.partialorder %v165_v63, 0.0004427343 }
  0xac   :  { %v176_v60 = vmul.f32 0.6931472, %v231_v8 }
  0xad   :  { %v164_v4 = vmul.f32 %v229_v54, %v163_v61 }
  0xae   :  { %v182_v2 = vsel %vm181_vm8, %v179_v0, %v176_v60 }
  0xaf   :  { %v183_v11 = vsub.f32 %v169_v6, %v182_v2 }
  0xb1   :  { %v233_v1 = vpop.eup %232 }
  0xb2   :  { %v161_v3 = vmul.f32 0.6931472, %v233_v1 }
  0xb4   :  { %v167_v10 = vsel %vm166_vm9, %v164_v4, %v161_v3 }
  0xb5   :  { %v168_v12 = vsub.f32 %v154_v7, %v167_v10 }
  0xb7   :  { %v184_v13 = vadd.f32 %v183_v11, %v168_v12 }
  0xb9   :  { %v193_v14 = vsel %vm192_vm10, %v184_v13, 0.0 }
  0xba   :  { %v195_v15 = vsel %vm194_vm11, %v193_v14, 0.0 }
  0xbb   :  { %196 = vadd.xlane.f32.xlu1 %v195_v15 }
 0x12e   :  { %v197_v16 = vpop.xlane.xlu1 %196 }
 0x12f   :  { %v198_v17 = vrot.slane %v197_v16, 4 }
 0x131   :  { %v199_v18 = vadd.f32 %v198_v17, %v197_v16 }
 0x133   :  { %v200_v19 = vrot.slane %v199_v18, 2 }
 0x135   :  { %v201_v20 = vadd.f32 %v200_v19, %v199_v18 }
 0x137   :  { %v202_v21 = vrot.slane %v201_v20, 1 }
 0x139   :  { %v203_v22 = vadd.f32 %v202_v21, %v201_v20 }
 0x13b   :  { %223 = vpush %v203_v22 }
 0x16c   :  { %s224_s12 = spop %223 }
 0x16d   :  { %v205_v23 = vstv %s224_s12 }
 0x16e   :  { %206 = vst [vmem:[#allocation4] sm:$0xff] %v205_v23 }
 0x16f   :  { %217 = dma.vmem_to_hbm [thread:$0]  %s213_s9, 128, %s215_s11, [#allocation5]  }
 0x170   :  { %258 = dma.done.wait [#allocation5], 128  }
 0x171   :  { %259 = vsyncadd [#allocation5], 4294967168 }
 0x172   :  { %222 = vsyncpa [#allocation5], 1 }

</bundles_post_ra>
